<compile_context>
chip_gen: v6e
topology: v6e:2x2x1
jax: 0.10.0
libtpu: 0.0.40
codegen_flags: <defaults>
</compile_context>

<pallas_src>
import functools
import math

import jax
import jax.numpy as jnp
from jax.experimental import pallas as pl
from jax.experimental.pallas import tpu as pltpu

LANES = 128
SUBLANES = 8
_VMEM_HEADROOM = 16 << 20   # on top of the double-buffered input/output blocks
_VMEM_CEILING = 48 << 20    # safe on v7x (64 MiB physical per TC)


def _round_up(a, b):
    return (a + b - 1) // b * b


def _pow_const(x, gamma):
    """x**gamma for x >= 0 with gamma a compile-time Python float."""
    g = float(gamma)
    if g == 0.0:
        return jnp.ones_like(x)
    if g.is_integer() and 0 < g <= 8:
        y = x
        for _ in range(int(g) - 1):
            y = y * x
        return y
    safe = jnp.maximum(x, jnp.float32(1e-30))
    return jnp.where(x > 0, jnp.exp(jnp.float32(g) * jnp.log(safe)),
                     jnp.zeros_like(x))


def _focal_core(x, t, alpha, gamma):
    """Per-element focal loss in fp32 regardless of input dtype."""
    x = x.astype(jnp.float32)
    t = t.astype(jnp.float32)
    bce = jnp.maximum(x, 0.0) - x * t + jnp.log1p(jnp.exp(-jnp.abs(x)))
    pt = jnp.exp(-bce)
    w = _pow_const(1.0 - pt, gamma)
    return jnp.float32(alpha) * w * bce


# ----------------------------- reduce kernel ---------------------------------

def _focal_reduce_kernel(x_ref, t_ref, o_ref, *, alpha, gamma, scale, total,
                         tm, chunk_blocks, full_blocks, needs_mask):
    p = pl.program_id(0)          # parallel row-chunk (v7x: one per TC)
    j = pl.program_id(1)          # sequential blocks inside the chunk

    @pl.when(j == 0)
    def _():
        o_ref[...] = jnp.zeros_like(o_ref)

    fl = _focal_core(x_ref[...], t_ref[...], alpha, gamma)

    def _accum(vals):
        # Only a sublane-axis sum in the steady state; cross-lane reduction
        # happens once in the wrapper.
        o_ref[...] += jnp.sum(vals, axis=0, keepdims=True).reshape(o_ref.shape)

    if needs_mask:
        blk = p * chunk_blocks + j          # logical (unclamped) row block

        @pl.when(blk < full_blocks)
        def _():
            _accum(fl)

        @pl.when(blk >= full_blocks)       # only tail block(s) pay the mask
        def _():
            full_rows = total // LANES
            rem = total % LANES
            grow = blk * tm + jax.lax.broadcasted_iota(jnp.int32, fl.shape, 0)
            valid = grow < full_rows
            if rem:
                lane = jax.lax.broadcasted_iota(jnp.int32, fl.shape, 1)
                valid = valid | ((grow == full_rows) & (lane < rem))
            _accum(jnp.where(valid, fl, 0.0))
    else:
        _accum(fl)

    @pl.when(j == pl.num_programs(1) - 1)
    def _():
        o_ref[...] = o_ref[...] * jnp.float32(scale)


# --------------------------- elementwise kernel -------------------------------

def _focal_elem_kernel(x_ref, t_ref, o_ref, *, alpha, gamma):
    o_ref[...] = _focal_core(x_ref[...], t_ref[...], alpha,
                             gamma).astype(o_ref.dtype)


# --------------------------------- wrapper ------------------------------------

def _pick_tile(rows, block_rows, cap=8192):
    tm_req = min(max(SUBLANES, _round_up(int(block_rows), SUBLANES)), cap)
    if rows <= tm_req:
        return rows                     # single full-array block (always legal)
    return tm_req


def _vmem_limit(buf_bytes):
    return int(min(buf_bytes + _VMEM_HEADROOM, _VMEM_CEILING))


def focal_loss(logits, targets, alpha=0.25, gamma=2.0, reduction="mean",
               block_rows=8192):
    """Fused Pallas TPU implementation of FocalLoss.forward."""
    assert logits.shape == targets.shape, (logits.shape, targets.shape)
    orig_shape = logits.shape
    total = int(math.prod(orig_shape)) if orig_shape else 1

    rows = -(-total // LANES)
    padded_total = rows * LANES

    xf = logits.reshape(-1)
    tf = targets.reshape(-1)
    if padded_total != total:
        # Only when the element count is not a multiple of 128 (needed for the
        # lane-dense reshape). Padded elements are masked in-kernel / sliced.
        pad = padded_total - total
        xf = jnp.pad(xf, (0, pad))
        tf = jnp.pad(tf, (0, pad))
    x2 = xf.reshape(rows, LANES)
    t2 = tf.reshape(rows, LANES)
    in_itemsize = x2.dtype.itemsize + t2.dtype.itemsize

    if reduction in ("mean", "sum"):
        tm = _pick_tile(rows, block_rows)
        row_blocks = -(-rows // tm)
        P = 2 if row_blocks >= 2 else 1          # 2 chunks -> both v7x TCs
        J = -(-row_blocks // P)
        full_blocks = total // (tm * LANES)
        needs_mask = total != P * J * tm * LANES
        scale = (1.0 / total) if reduction == "mean" else 1.0

        if P * J == row_blocks:
            in_map = lambda p, j: (p * J + j, 0)
        else:
            last_blk = row_blocks - 1            # clamp the single OOB step
            in_map = lambda p, j: (jnp.minimum(p * J + j, last_blk), 0)

        buf_bytes = 2 * tm * LANES * in_itemsize
        out = pl.pallas_call(
            functools.partial(_focal_reduce_kernel, alpha=float(alpha),
                              gamma=float(gamma), scale=float(scale),
                              total=total, tm=tm, chunk_blocks=J,
                              full_blocks=full_blocks, needs_mask=needs_mask),
            grid=(P, J),
            in_specs=[pl.BlockSpec((tm, LANES), in_map),
                      pl.BlockSpec((tm, LANES), in_map)],
            out_specs=pl.BlockSpec((1, 1, LANES), lambda p, j: (p, 0, 0)),
            out_shape=jax.ShapeDtypeStruct((P, 1, LANES), jnp.float32),
            compiler_params=pltpu.CompilerParams(
                dimension_semantics=("parallel", "arbitrary"),
                vmem_limit_bytes=_vmem_limit(buf_bytes)),
            cost_estimate=pl.CostEstimate(
                flops=12 * total, transcendentals=3 * total,
                bytes_accessed=total * in_itemsize + 4 * P * LANES),
        )(x2, t2)
        return jnp.sum(out)                       # tiny final cross-lane sum

    elif reduction == "none":
        out_dtype = logits.dtype
        if not jnp.issubdtype(out_dtype, jnp.floating):
            out_dtype = jnp.float32
        tm = _pick_tile(rows, block_rows)
        row_blocks = -(-rows // tm)
        buf_bytes = 2 * tm * LANES * (in_itemsize + jnp.dtype(out_dtype).itemsize)
        out = pl.pallas_call(
            functools.partial(_focal_elem_kernel, alpha=float(alpha),
                              gamma=float(gamma)),
            grid=(row_blocks,),
            in_specs=[pl.BlockSpec((tm, LANES), lambda i: (i, 0)),
                      pl.BlockSpec((tm, LANES), lambda i: (i, 0))],
            out_specs=pl.BlockSpec((tm, LANES), lambda i: (i, 0)),
            out_shape=jax.ShapeDtypeStruct((rows, LANES), out_dtype),
            compiler_params=pltpu.CompilerParams(
                dimension_semantics=("parallel",),
                vmem_limit_bytes=_vmem_limit(buf_bytes)),
            cost_estimate=pl.CostEstimate(
                flops=12 * total, transcendentals=3 * total,
                bytes_accessed=total * (in_itemsize
                                        + jnp.dtype(out_dtype).itemsize)),
        )(x2, t2)
        if padded_total != total:
            return out.reshape(-1)[:total].reshape(orig_shape)
        return out.reshape(orig_shape)
    else:
        raise ValueError(f"unsupported reduction: {reduction!r}")


# -------------------------- pure-JAX reference --------------------------------

def _focal_loss_ref(logits, targets, alpha=0.25, gamma=2.0, reduction="mean"):
    x = logits.astype(jnp.float32)
    t = targets.astype(jnp.float32)
    bce = jnp.maximum(x, 0.0) - x * t + jnp.log1p(jnp.exp(-jnp.abs(x)))
    pt = jnp.exp(-bce)
    fl = alpha * (1.0 - pt) ** gamma * bce
    if reduction == "mean":
        return jnp.mean(fl)
    if reduction == "sum":
        return jnp.sum(fl)
    return fl


# --------------------------------- main ----------------------------------------

if __name__ == "__main__":
    key = jax.random.PRNGKey(0)
    k1, k2, k3, k4, k5, k6 = jax.random.split(key, 6)

    # Main check: 4-D logits (2,4,16,16) = 2048 elems -> no pad, single block.
    logits = jax.random.normal(k1, (2, 4, 16, 16), jnp.float32)
    targets = jax.random.bernoulli(k2, 0.3, (2, 4, 16, 16)).astype(jnp.float32)
    ref = _focal_loss_ref(logits, targets, 0.25, 2.0, "mean")

    loss = jax.block_until_ready(
        focal_loss(logits, targets, alpha=0.25, gamma=2.0, reduction="mean"))
    assert loss.shape == ()
    assert bool(jnp.isfinite(loss))
    assert bool(jnp.allclose(loss, ref, rtol=1e-5, atol=1e-6)), (loss, ref)

    # Same data with tiny tiles -> exercises the 2-chunk (parallel) grid.
    loss2 = jax.block_until_ready(
        focal_loss(logits, targets, reduction="mean", block_rows=8))
    assert bool(jnp.allclose(loss2, ref, rtol=1e-5, atol=1e-6)), (loss2, ref)

    # Uneven block count (3 blocks over 2 chunks) + partial last block.
    logits3 = jax.random.normal(k5, (40, 128), jnp.float32)
    targets3 = jax.random.bernoulli(k6, 0.4, (40, 128)).astype(jnp.float32)
    m3 = jax.block_until_ready(
        focal_loss(logits3, targets3, reduction="mean", block_rows=16))
    m3_ref = _focal_loss_ref(logits3, targets3, reduction="mean")
    assert bool(jnp.allclose(m3, m3_ref, rtol=1e-5, atol=1e-6)), (m3, m3_ref)

    # 'sum' on a ragged size (185 elements -> pad-to-128 + in-kernel masking).
    logits4 = jax.random.normal(k3, (37, 5), jnp.float32)
    targets4 = jax.random.bernoulli(k4, 0.5, (37, 5)).astype(jnp.float32)
    s = jax.block_until_ready(focal_loss(logits4, targets4, reduction="sum"))
    s_ref = _focal_loss_ref(logits4, targets4, reduction="sum")
    assert bool(jnp.allclose(s, s_ref, rtol=1e-5, atol=1e-5)), (s, s_ref)

    # 'none': per-element output restored to the original shape.
    fl_none = jax.block_until_ready(
        focal_loss(logits4, targets4, reduction="none"))
    fl_ref = _focal_loss_ref(logits4, targets4, reduction="none")
    assert fl_none.shape == logits4.shape
    assert bool(jnp.allclose(fl_none, fl_ref, rtol=1e-5, atol=1e-6))

    print("KERNEL_OK")
</pallas_src>

<mosaic_0001>
module attributes {stable_mosaic.version = 11 : i64} {
  func.func @_focal_reduce_kernel(%arg0: i32, %arg1: i32, %arg2: memref<16x128xf32, #tpu.memory_space<vmem>>, %arg3: memref<16x128xf32, #tpu.memory_space<vmem>>, %arg4: memref<1x1x128xf32, #tpu.memory_space<vmem>>) attributes {dimension_semantics = [#tpu.dimension_semantics<parallel>, #tpu.dimension_semantics<arbitrary>], iteration_bounds = array<i64: 1, 1>, scalar_prefetch = 0 : i64, scratch_operands = 0 : i64, tpu.core_type = #tpu.core_type<tc>, window_params = [{transform_indices = @transform_0, window_bounds = array<i64: 16, 128>}, {transform_indices = @transform_1, window_bounds = array<i64: 16, 128>}, {transform_indices = @transform_2, window_bounds = array<i64: 1, 1, 128>}]} {
    %c0_i32 = arith.constant 0 : i32
    %0 = arith.cmpi eq, %arg1, %c0_i32 : i32
    %1 = arith.extui %0 : i1 to i32
    %c0_i32_0 = arith.constant 0 : i32
    %2 = arith.cmpi ne, %1, %c0_i32_0 : i32
    scf.if %2 {
      %cst_17 = arith.constant 0.000000e+00 : f32
      %33 = vector.broadcast %cst_17 : f32 to vector<1x1x128xf32>
      %c0_18 = arith.constant 0 : index
      %c0_19 = arith.constant 0 : index
      %c0_20 = arith.constant 0 : index
      %34 = vector.load %arg4[%c0_18, %c0_19, %c0_20] : memref<1x1x128xf32, #tpu.memory_space<vmem>>, vector<1x1x128xf32>
      tpu.vector_store %arg4[%c0_18, %c0_19, %c0_20], %33 {strides = array<i32>} : memref<1x1x128xf32, #tpu.memory_space<vmem>>, vector<1x1x128xf32>,
    } else {
    }
    %c0 = arith.constant 0 : index
    %c0_1 = arith.constant 0 : index
    %3 = vector.load %arg2[%c0, %c0_1] : memref<16x128xf32, #tpu.memory_space<vmem>>, vector<16x128xf32>
    %c0_2 = arith.constant 0 : index
    %c0_3 = arith.constant 0 : index
    %4 = vector.load %arg3[%c0_2, %c0_3] : memref<16x128xf32, #tpu.memory_space<vmem>>, vector<16x128xf32>
    %cst = arith.constant 0.000000e+00 : f32
    %5 = vector.broadcast %cst : f32 to vector<16x128xf32>
    %6 = arith.maximumf %3, %5 : vector<16x128xf32>
    %7 = arith.mulf %3, %4 : vector<16x128xf32>
    %8 = arith.subf %6, %7 : vector<16x128xf32>
    %9 = math.absf %3 : vector<16x128xf32>
    %cst_4 = arith.constant 0.000000e+00 : f32
    %10 = vector.broadcast %cst_4 : f32 to vector<16x128xf32>
    %11 = arith.subf %10, %9 : vector<16x128xf32>
    %12 = math.exp %11 : vector<16x128xf32>
    %13 = math.log1p %12 : vector<16x128xf32>
    %14 = arith.addf %8, %13 : vector<16x128xf32>
    %cst_5 = arith.constant 0.000000e+00 : f32
    %15 = vector.broadcast %cst_5 : f32 to vector<16x128xf32>
    %16 = arith.subf %15, %14 : vector<16x128xf32>
    %17 = math.exp %16 : vector<16x128xf32>
    %cst_6 = arith.constant 1.000000e+00 : f32
    %18 = vector.broadcast %cst_6 : f32 to vector<16x128xf32>
    %19 = arith.subf %18, %17 : vector<16x128xf32>
    %20 = arith.mulf %19, %19 : vector<16x128xf32>
    %cst_7 = arith.constant 2.500000e-01 : f32
    %21 = vector.broadcast %cst_7 : f32 to vector<16x128xf32>
    %22 = arith.mulf %21, %20 : vector<16x128xf32>
    %23 = arith.mulf %22, %14 : vector<16x128xf32>
    %c0_8 = arith.constant 0 : index
    %c0_9 = arith.constant 0 : index
    %c0_10 = arith.constant 0 : index
    %24 = vector.load %arg4[%c0_8, %c0_9, %c0_10] : memref<1x1x128xf32, #tpu.memory_space<vmem>>, vector<1x1x128xf32>
    %cst_11 = arith.constant dense<0.000000e+00> : vector<128xf32>
    %25 = vector.multi_reduction <add>, %23, %cst_11 [0] : vector<16x128xf32> to vector<128xf32>
    %26 = vector.shape_cast %25 : vector<128xf32> to vector<1x128xf32>
    %27 = vector.shape_cast %26 : vector<1x128xf32> to vector<1x1x128xf32>
    %28 = arith.addf %24, %27 : vector<1x1x128xf32>
    %c0_12 = arith.constant 0 : index
    %c0_13 = arith.constant 0 : index
    %c0_14 = arith.constant 0 : index
    %29 = vector.load %arg4[%c0_12, %c0_13, %c0_14] : memref<1x1x128xf32, #tpu.memory_space<vmem>>, vector<1x1x128xf32>
    tpu.vector_store %arg4[%c0_12, %c0_13, %c0_14], %28 {strides = array<i32>} : memref<1x1x128xf32, #tpu.memory_space<vmem>>, vector<1x1x128xf32>,
    %c0_i32_15 = arith.constant 0 : i32
    %30 = arith.cmpi eq, %arg1, %c0_i32_15 : i32
    %31 = arith.extui %30 : i1 to i32
    %c0_i32_16 = arith.constant 0 : i32
    %32 = arith.cmpi ne, %31, %c0_i32_16 : i32
    scf.if %32 {
      %c0_17 = arith.constant 0 : index
      %c0_18 = arith.constant 0 : index
      %c0_19 = arith.constant 0 : index
      %33 = vector.load %arg4[%c0_17, %c0_18, %c0_19] : memref<1x1x128xf32, #tpu.memory_space<vmem>>, vector<1x1x128xf32>
      %cst_20 = arith.constant 4.8828125E-4 : f32
      %34 = vector.broadcast %cst_20 : f32 to vector<1x1x128xf32>
      %35 = arith.mulf %33, %34 : vector<1x1x128xf32>
      %c0_21 = arith.constant 0 : index
      %c0_22 = arith.constant 0 : index
      %c0_23 = arith.constant 0 : index
      %36 = vector.load %arg4[%c0_21, %c0_22, %c0_23] : memref<1x1x128xf32, #tpu.memory_space<vmem>>, vector<1x1x128xf32>
      tpu.vector_store %arg4[%c0_21, %c0_22, %c0_23], %35 {strides = array<i32>} : memref<1x1x128xf32, #tpu.memory_space<vmem>>, vector<1x1x128xf32>,
    } else {
    }
    return
  }
  func.func @transform_0(%arg0: i32, %arg1: i32) -> (i32, i32) {
    %c1_i32 = arith.constant 1 : i32
    %0 = arith.muli %arg0, %c1_i32 : i32
    %1 = arith.addi %0, %arg1 : i32
    %c0_i32 = arith.constant 0 : i32
    %c0_i32_0 = arith.constant 0 : i32
    return %1, %c0_i32 : i32, i32
  }
  func.func @transform_1(%arg0: i32, %arg1: i32) -> (i32, i32) {
    %c1_i32 = arith.constant 1 : i32
    %0 = arith.muli %arg0, %c1_i32 : i32
    %1 = arith.addi %0, %arg1 : i32
    %c0_i32 = arith.constant 0 : i32
    %c0_i32_0 = arith.constant 0 : i32
    return %1, %c0_i32 : i32, i32
  }
  func.func @transform_2(%arg0: i32, %arg1: i32) -> (i32, i32, i32) {
    %c0_i32 = arith.constant 0 : i32
    %c0_i32_0 = arith.constant 0 : i32
    %c0_i32_1 = arith.constant 0 : i32
    return %arg0, %c0_i32, %c0_i32_0 : i32, i32, i32
  }
}

</mosaic_0001>

<bundles_post_ra>
// kernel: tpu_custom_call.1
= control target key start
LH: loop header
LB: loop body
LE: loop exit
PB: predicated region body
PF: predicated region fallthrough
CT: control target
= control target key end

     0   :  { %7 = vsyncpa [#allocation3], 0  ;;  %s255_s0 = inlined_call_operand.hbm [shape: f32[16,128], index: 0, kind: input, shape index: {}]   ;;  %s256_s1 = inlined_call_operand.hbm [shape: f32[16,128], index: 1, kind: input, shape index: {}]   ;;  %s257_s2 = inlined_call_operand.hbm [shape: f32[1,1,128], index: 2, kind: output, shape index: {}]  }
   0x1   :  { %8 = vsyncpa [#allocation6], 0 }
   0x2   :  { %9 = vsyncpa [#allocation4], 0  ;;  %s225_s9 = smov [#allocation2]  }
   0x3   :  { %s19_s10 = sshll.u32 %s225_s9, 4  ;;  %s20_s10 = int_to_ptr.vmem [resolvable:$true] %s19_s10 }
   0x4   :  { %s167_s11 = scalar_lea.vmem %s20_s10, 256  ;;  %p172_p1 = scmp.lt.s32.totalorder %s20_s10, %s20_s10 }
   0x5   :  { %p168_p0 = scmp.ne.s32.totalorder %s20_s10, %s167_s11  ;;  %p173_p2 = scmp.lt.s32.totalorder %s167_s11, %s167_s11 }
   0x7   :  { %p174_p3 = por %p173_p2, %p172_p1 }
   0x9   :  { %p175_p4 = pnand %p174_p3, %p168_p0 }
   0xb   :  { %178 = shalt.err (!%p175_p4)
}
   0xc   :  { %s226_s12 = smov 128   ;;  %s227_s13 = smov 8  }
   0xd   :  { %25 = dma.hbm_to_vmem [thread:$0]  %s255_s0, 256, %s20_s10, [#allocation3], %s226_s12, %s226_s12, %s227_s13  }
   0xe   :  { %s228_s16 = smov [#allocation5]  }
   0xf   :  { %s35_s17 = sshll.u32 %s228_s16, 4  ;;  %s36_s17 = int_to_ptr.vmem [resolvable:$true] %s35_s17 }
  0x10   :  { %s187_s18 = scalar_lea.vmem %s36_s17, 256  ;;  %p192_p6 = scmp.lt.s32.totalorder %s36_s17, %s36_s17 }
  0x11   :  { %p188_p5 = scmp.ne.s32.totalorder %s36_s17, %s187_s18  ;;  %p193_p7 = scmp.lt.s32.totalorder %s187_s18, %s187_s18 }
  0x13   :  { %p194_p8 = por %p193_p7, %p192_p6 }
  0x15   :  { %p195_p9 = pnand %p194_p8, %p188_p5 }
  0x17   :  { %198 = shalt.err (!%p195_p9)
}
  0x18   :  { %41 = dma.hbm_to_vmem [thread:$0]  %s256_s1, 256, %s36_s17, [#allocation6], %s226_s12, %s226_s12, %s227_s13  }
  0x19   :  { %219 = dma.done.wait [#allocation3], 256  }
  0x1a   :  { %220 = vsyncadd [#allocation3], 4294967040 }
  0x1b   :  { %221 = dma.done.wait [#allocation6], 256  }
  0x1c   :  { %222 = vsyncadd [#allocation6], 4294967040  ;;  %v229_v0 = vmov 0.0   ;;  %v57_v1 = vld [vmem:[#allocation2] sm:$0xff]  ;;  %v58_v2 = vld [vmem:[#allocation2 + $0x8] sm:$0xff]  ;;  %s230_s0 = smov [#allocation7]  }
  0x1d   :  { %56 = vst [vmem:[#allocation7] sm:$0x1] %v229_v0  ;;  %v67_v3 = vand.u32 2147483647, %v57_v1  ;;  %v68_v4 = vand.u32 2147483647, %v58_v2 }
  0x1e   :  { %v59_v15 = vld [vmem:[#allocation5] sm:$0xff]  ;;  %v60_v16 = vld [vmem:[#allocation5 + $0x8] sm:$0xff]  ;;  %v61_v18 = vmax.f32 %v57_v1, 0.0  ;;  %v62_v22 = vmax.f32 %v58_v2, 0.0  ;;  %s131_s1 = sshll.u32 %s230_s0, 4  ;;  %s132_s1 = int_to_ptr.vmem [resolvable:$true] %s131_s1 }
  0x1f   :  { %v69_v5 = vsub.f32 0.0, %v67_v3  ;;  %v70_v6 = vsub.f32 0.0, %v68_v4  ;;  %v63_v19 = vmul.f32 %v59_v15, %v57_v1  ;;  %v64_v23 = vmul.f32 %v60_v16, %v58_v2  ;;  %s199_s21 = scalar_lea.vmem %s132_s1, 16  ;;  %s203_s22 = scalar_lea.vmem %s132_s1, 32 }
  0x20   :  { %p200_p10 = scmp.ne.s32.totalorder %s132_s1, %s199_s21  ;;  %p204_p11 = scmp.lt.s32.totalorder %s132_s1, %s132_s1 }
  0x21   :  { %v71_v7 = vmul.f32 1.442695, %v69_v5  ;;  %v73_v8 = vmul.f32 1.442695, %v70_v6  ;;  %v65_v27 = vsub.f32 %v61_v18, %v63_v19  ;;  %v66_v30 = vsub.f32 %v62_v22, %v64_v23  ;;  %p205_p12 = scmp.lt.s32.totalorder %s203_s22, %s199_s21 }
  0x23   :  { %147 = vpow2.f32 %v71_v7  ;;  %p206_p13 = por %p205_p12, %p204_p11 }
  0x24   :  { %149 = vpow2.f32 %v73_v8  ;;  %v109_v57 = vld [vmem:[#allocation7] sm:$0x1] }
  0x25   :  { %p207_p0 = pnand %p206_p13, %p200_p10 }
  0x30   :  { %v148_v9 = vpop.eup %147 }
  0x31   :  { %v150_v10 = vpop.eup %149  ;;  %v75_v11 = vadd.f32 1.0, %v148_v9  ;;  %v78_v13 = vmul.f32 -0.5, %v148_v9  ;;  %v81_v20 = vand.u32 2147483647, %v148_v9 }
  0x32   :  { %v84_v12 = vadd.f32 1.0, %v150_v10  ;;  %v87_v14 = vmul.f32 -0.5, %v150_v10  ;;  %v90_v24 = vand.u32 2147483647, %v150_v10 }
  0x33   :  { %151 = vlog2.f32 %v75_v11  ;;  %v79_v17 = vadd.f32 1.0, %v78_v13  ;;  %vm82_vm0 = vcmp.lt.f32.partialorder %v81_v20, 0.0004427343 }
  0x34   :  { %153 = vlog2.f32 %v84_v12  ;;  %v88_v21 = vadd.f32 1.0, %v87_v14  ;;  %vm91_vm1 = vcmp.lt.f32.partialorder %v90_v24, 0.0004427343 }
  0x35   :  { %v80_v25 = vmul.f32 %v148_v9, %v79_v17 }
  0x36   :  { %v89_v28 = vmul.f32 %v150_v10, %v88_v21 }
  0x40   :  { %v152_v26 = vpop.eup %151 }
  0x41   :  { %v154_v29 = vpop.eup %153  ;;  %v77_v31 = vmul.f32 0.6931472, %v152_v26 }
  0x42   :  { %v86_v32 = vmul.f32 0.6931472, %v154_v29 }
  0x43   :  { %v83_v33 = vsel %vm82_vm0, %v80_v25, %v77_v31 }
  0x44   :  { %v92_v34 = vsel %vm91_vm1, %v89_v28, %v86_v32  ;;  %v93_v35 = vadd.f32 %v83_v33, %v65_v27 }
  0x45   :  { %v94_v36 = vadd.f32 %v92_v34, %v66_v30 }
  0x46   :  { %v95_v37 = vsub.f32 0.0, %v93_v35 }
  0x47   :  { %v96_v38 = vsub.f32 0.0, %v94_v36 }
  0x48   :  { %v97_v39 = vmul.f32 1.442695, %v95_v37 }
  0x49   :  { %v99_v40 = vmul.f32 1.442695, %v96_v38 }
  0x4a   :  { %155 = vpow2.f32 %v97_v39 }
  0x4b   :  { %157 = vpow2.f32 %v99_v40 }
  0x57   :  { %v156_v41 = vpop.eup %155 }
  0x58   :  { %v158_v42 = vpop.eup %157  ;;  %v101_v43 = vsub.f32 1.0, %v156_v41 }
  0x59   :  { %v102_v44 = vsub.f32 1.0, %v158_v42 }
  0x5a   :  { %v103_v45 = vmul.f32 %v101_v43, %v101_v43 }
  0x5b   :  { %v104_v46 = vmul.f32 %v102_v44, %v102_v44 }
  0x5c   :  { %v105_v47 = vmul.f32 0.25, %v103_v45 }
  0x5d   :  { %v106_v48 = vmul.f32 0.25, %v104_v46 }
  0x5e   :  { %v107_v49 = vmul.f32 %v105_v47, %v93_v35 }
  0x5f   :  { %v108_v50 = vmul.f32 %v106_v48, %v94_v36 }
  0x61   :  { %v110_v51 = vadd.f32 %v108_v50, %v107_v49 }
  0x63   :  { %v111_v52 = vrot.slane %v110_v51, 4 }
  0x65   :  { %v112_v53 = vadd.f32 %v111_v52, %v110_v51 }
  0x67   :  { %v113_v54 = vrot.slane %v112_v53, 2 }
  0x69   :  { %v114_v55 = vadd.f32 %v113_v54, %v112_v53 }
  0x6b   :  { %v115_v56 = vrot.slane %v114_v55, 1 }
  0x6d   :  { %v116_v58 = vadd.f32 %v115_v56, %v114_v55 }
  0x6f   :  { %v117_v59 = vadd.f32 %v116_v58, %v109_v57 }
  0x71   :  { %118 = vst [vmem:[#allocation7] sm:$0x1] %v117_v59 }
  0x78   :  { %v122_v60 = vld [vmem:[#allocation7] sm:$0x1] }
  0x79   :  { %v123_v61 = vmul.f32 0.00048828125, %v122_v60 }
  0x7b   :  { %124 = vst [vmem:[#allocation7] sm:$0x1] %v123_v61 }
  0x7c   :  { %210 = shalt.err (!%p207_p0)
}
  0x7d   :  { %134 = dma.vmem_to_hbm [thread:$0]  %s132_s1, 16, %s257_s2, [#allocation4]  }
  0x7e   :  { %223 = dma.done.wait [#allocation4], 16  }
  0x7f   :  { %224 = vsyncadd [#allocation4], 4294967280 }
  0x80   :  { %138 = vsyncpa [#allocation3], 1 }
  0x81   :  { %139 = vsyncpa [#allocation6], 1 }
  0x82   :  { %140 = vsyncpa [#allocation4], 1 }

</bundles_post_ra>
